<compile_context>
chip_gen: v5e
topology: v5e:2x2
jax: 0.10.0
libtpu: 0.0.40
codegen_flags: <defaults>
</compile_context>

<pallas_src>
import jax
import jax.numpy as jnp
from jax.experimental import pallas as pl
from jax.experimental.pallas import tpu as pltpu


def _make_pers_kernel(feat_dims, nhid2, nhid, nout):
    """Builds a fused MLP kernel for a fixed set of modality widths."""
    n_feat = len(feat_dims)
    offsets = []
    off = 0
    for d in feat_dims:
        offsets.append(off)
        off += d
    vote_row = off          # == ninp - 2
    dur_row = off + 1       # == ninp - 1

    def kernel(*refs):
        feat_refs = refs[:n_feat]
        vote_ref = refs[n_feat]
        dur_ref = refs[n_feat + 1]
        w1_ref, b1_ref, w2_ref, b2_ref, w3t_ref, b3_ref = refs[n_feat + 2:n_feat + 8]
        o_ref = refs[n_feat + 8]

        tb = feat_refs[0].shape[0]
        wdt = w1_ref.dtype                       # bf16 (or f32) weight dtype
        w1 = w1_ref[...]                         # (ninp, 2*nhid), tiny, loaded once

        # ---- fc1: fused concat as partial matmuls over row-slices of w1 ----
        acc = jnp.broadcast_to(b1_ref[...].astype(jnp.float32), (tb, nhid2))
        for idx in range(n_feat):
            o0 = offsets[idx]
            d = feat_dims[idx]
            xb = feat_refs[idx][...].astype(wdt)                     # (tb, d)
            acc = acc + jnp.dot(xb, w1[o0:o0 + d, :],
                                preferred_element_type=jnp.float32)
        # vote_st / dur columns: rank-1 VPU updates (avoid a 1-wide MXU column)
        w_vote = w1[vote_row:vote_row + 1, :].astype(jnp.float32)    # (1, 2*nhid)
        w_dur = w1[dur_row:dur_row + 1, :].astype(jnp.float32)       # (1, 2*nhid)
        acc = acc + vote_ref[...] * w_vote + dur_ref[...] * w_dur

        # dropout is identity in eval mode
        # TODO(synk): training-mode dropout not implemented (eval-mode forward only).
        h1 = jnp.maximum(acc, 0.0)                                   # (tb, 2*nhid)

        # ---- fc2 (MXU) + relu ----
        h2 = jnp.dot(h1.astype(wdt), w2_ref[...],
                     preferred_element_type=jnp.float32)
        h2 = jnp.maximum(h2 + b2_ref[...].astype(jnp.float32), 0.0)  # (tb, nhid)

        # ---- fc3: K=nhid, N=nout (tiny) -> VPU path when nout == 1 ----
        if nout == 1:
            w3t = w3t_ref[...].astype(jnp.float32)                   # (1, nhid)
            h3 = jnp.sum(h2 * w3t, axis=-1, keepdims=True)           # (tb, 1)
        else:
            h3 = jax.lax.dot_general(
                h2.astype(wdt), w3t_ref[...],
                dimension_numbers=(((1,), (1,)), ((), ())),
                preferred_element_type=jnp.float32)                  # (tb, nout)
        h3 = h3 + b3_ref[...].astype(jnp.float32)

        o_ref[...] = jax.nn.sigmoid(h3)

    return kernel


def pers_forward(in_mod, vote_st, dur, align_emb, params, *, tile_b=2048):
    """Pers forward pass. `in_mod` iteration order must match the PyTorch module's
    modality order (note: under jit, dicts iterate in sorted-key order)."""
    w1, b1, w2, b2, w3, b3 = params
    ninp, nhid2 = int(w1.shape[0]), int(w1.shape[1])
    nhid, nout = int(w2.shape[1]), int(w3.shape[1])

    feats = [v.astype(jnp.float32) for _, v in in_mod.items()]
    feats.append(align_emb.astype(jnp.float32))
    feat_dims = [int(f.shape[1]) for f in feats]
    assert sum(feat_dims) + 2 == ninp, "modality widths must match fc1 input size"

    B = int(feats[0].shape[0])
    vote = vote_st.astype(jnp.float32)[:, None]                      # (B, 1)
    dur2 = dur.astype(jnp.float32)[:, None]                          # (B, 1)

    # Batch tiling: tile must be a multiple of 8 (sublanes); pad batch so every
    # grid step sees a full, aligned block.
    b_pad8 = ((B + 7) // 8) * 8
    tb = max(8, (min(tile_b, b_pad8) // 8) * 8)
    nb = pl.cdiv(b_pad8, tb)
    b_total = nb * tb
    if b_total != B:
        pad = b_total - B
        feats = [jnp.pad(f, ((0, pad), (0, 0))) for f in feats]
        vote = jnp.pad(vote, ((0, pad), (0, 0)))
        dur2 = jnp.pad(dur2, ((0, pad), (0, 0)))

    # fc3 weight passed transposed so the nout==1 path is a pure VPU broadcast.
    w3t = jnp.transpose(w3)                                          # (nout, nhid)

    kernel = _make_pers_kernel(feat_dims, nhid2, nhid, nout)

    def batch_spec(cols):
        return pl.BlockSpec((tb, cols), lambda i: (i, 0))

    def resident_spec(arr):
        return pl.BlockSpec(tuple(int(s) for s in arr.shape), lambda i: (0, 0))

    in_specs = (
        [batch_spec(d) for d in feat_dims]
        + [batch_spec(1), batch_spec(1)]
        + [resident_spec(w1), resident_spec(b1),
           resident_spec(w2), resident_spec(b2),
           resident_spec(w3t), resident_spec(b3)]
    )

    flops = 2 * b_total * (ninp * nhid2 + nhid2 * nhid + nhid * nout)
    bytes_accessed = (
        b_total * (sum(feat_dims) + 2) * 4                           # activations in
        + b_total * nout * 4                                         # output
        + int(w1.size + w2.size + w3.size) * jnp.dtype(w1.dtype).itemsize
        + int(b1.size + b2.size + b3.size) * 4
    )

    out = pl.pallas_call(
        kernel,
        out_shape=jax.ShapeDtypeStruct((b_total, nout), jnp.float32),
        grid=(nb,),
        in_specs=in_specs,
        out_specs=pl.BlockSpec((tb, nout), lambda i: (i, 0)),
        compiler_params=pltpu.CompilerParams(dimension_semantics=("parallel",)),
        cost_estimate=pl.CostEstimate(
            flops=int(flops),
            transcendentals=int(b_total * nout),
            bytes_accessed=int(bytes_accessed)),
    )(*feats, vote, dur2, w1, b1, w2, b2, w3t, b3)

    return out[:B]


def init_params(key, ninp, nhid, nout):
    """Deterministic synthetic f32 parameters (PyTorch Linear shapes, stored as (in,out))."""
    ks = jax.random.split(key, 6)
    scale = 0.1
    w1 = scale * jax.random.normal(ks[0], (ninp, 2 * nhid), jnp.float32)
    b1 = scale * jax.random.normal(ks[1], (1, 2 * nhid), jnp.float32)
    w2 = scale * jax.random.normal(ks[2], (2 * nhid, nhid), jnp.float32)
    b2 = scale * jax.random.normal(ks[3], (1, nhid), jnp.float32)
    w3 = scale * jax.random.normal(ks[4], (nhid, nout), jnp.float32)
    b3 = scale * jax.random.normal(ks[5], (1, nout), jnp.float32)
    return (w1, b1, w2, b2, w3, b3)


def cast_params(params, weight_dtype=jnp.bfloat16):
    """Cast matmul weights to bf16 (f32 accumulate in-kernel); keep biases f32."""
    w1, b1, w2, b2, w3, b3 = params
    return (w1.astype(weight_dtype), b1,
            w2.astype(weight_dtype), b2,
            w3.astype(weight_dtype), b3)


def pers_reference(in_mod, vote_st, dur, align_emb, params):
    """Pure-JAX f32 reference mirroring the PyTorch forward (eval mode)."""
    inputs = [v for _, v in in_mod.items()] + [align_emb, vote_st[:, None], dur[:, None]]
    x = jnp.concatenate(inputs, axis=1).astype(jnp.float32)
    w1, b1, w2, b2, w3, b3 = params
    h = jnp.maximum(x @ w1 + b1, 0.0)
    h = jnp.maximum(h @ w2 + b2, 0.0)
    return jax.nn.sigmoid(h @ w3 + b3)


if __name__ == "__main__":
    # Module config (defaults): feat_dim=16, nmod=3, nhid=8, nout=1, is_pers_mlp=True
    feat_dim, nmod, nhid, nout = 16, 3, 8, 1
    ninp = feat_dim * (nmod + 1) + 2   # = 66
    B = 4

    key = jax.random.PRNGKey(0)
    k_in, k_p = jax.random.split(key)
    kmods = jax.random.split(k_in, nmod + 3)

    in_mod = {f"mod{i}": jax.random.normal(kmods[i], (B, feat_dim), jnp.float32)
              for i in range(nmod)}
    align_emb = jax.random.normal(kmods[nmod], (B, feat_dim), jnp.float32)
    vote_st = jax.random.normal(kmods[nmod + 1], (B,), jnp.float32)
    dur = jax.random.normal(kmods[nmod + 2], (B,), jnp.float32)

    params_f32 = init_params(k_p, ninp, nhid, nout)
    params_bf16 = cast_params(params_f32)        # bf16 weights: halves weight DMA on v6e/v7x

    out = jax.jit(pers_forward)(in_mod, vote_st, dur, align_emb, params_bf16)
    out = jax.block_until_ready(out)

    ref = pers_reference(in_mod, vote_st, dur, align_emb, params_f32)
    assert out.shape == (B, nout)
    # bf16 weights + bf16 matmul inputs (f32 accumulate) vs pure-f32 reference.
    assert jnp.allclose(out, ref, atol=2e-2, rtol=2e-2), (out, ref)

    print("KERNEL_OK")
</pallas_src>

<mosaic_0001>
module attributes {stable_mosaic.version = 11 : i64} {
  func.func @kernel(%arg0: i32, %arg1: memref<8x16xf32, #tpu.memory_space<vmem>>, %arg2: memref<8x16xf32, #tpu.memory_space<vmem>>, %arg3: memref<8x16xf32, #tpu.memory_space<vmem>>, %arg4: memref<8x16xf32, #tpu.memory_space<vmem>>, %arg5: memref<8x1xf32, #tpu.memory_space<vmem>>, %arg6: memref<8x1xf32, #tpu.memory_space<vmem>>, %arg7: memref<66x16xbf16, #tpu.memory_space<vmem>>, %arg8: memref<1x16xf32, #tpu.memory_space<vmem>>, %arg9: memref<16x8xbf16, #tpu.memory_space<vmem>>, %arg10: memref<1x8xf32, #tpu.memory_space<vmem>>, %arg11: memref<1x8xbf16, #tpu.memory_space<vmem>>, %arg12: memref<1x1xf32, #tpu.memory_space<vmem>>, %arg13: memref<8x1xf32, #tpu.memory_space<vmem>>) attributes {dimension_semantics = [#tpu.dimension_semantics<parallel>], iteration_bounds = array<i64: 1>, scalar_prefetch = 0 : i64, scratch_operands = 0 : i64, tpu.core_type = #tpu.core_type<tc>, window_params = [{transform_indices = @transform_0, window_bounds = array<i64: 8, 16>}, {transform_indices = @transform_1, window_bounds = array<i64: 8, 16>}, {transform_indices = @transform_2, window_bounds = array<i64: 8, 16>}, {transform_indices = @transform_3, window_bounds = array<i64: 8, 16>}, {transform_indices = @transform_4, window_bounds = array<i64: 8, 1>}, {transform_indices = @transform_5, window_bounds = array<i64: 8, 1>}, {pipeline_mode = #tpu.pipeline_mode<synchronous>, transform_indices = @transform_6, window_bounds = array<i64: 66, 16>}, {pipeline_mode = #tpu.pipeline_mode<synchronous>, transform_indices = @transform_7, window_bounds = array<i64: 1, 16>}, {pipeline_mode = #tpu.pipeline_mode<synchronous>, transform_indices = @transform_8, window_bounds = array<i64: 16, 8>}, {pipeline_mode = #tpu.pipeline_mode<synchronous>, transform_indices = @transform_9, window_bounds = array<i64: 1, 8>}, {pipeline_mode = #tpu.pipeline_mode<synchronous>, transform_indices = @transform_10, window_bounds = array<i64: 1, 8>}, {pipeline_mode = #tpu.pipeline_mode<synchronous>, transform_indices = @transform_11, window_bounds = array<i64: 1, 1>}, {transform_indices = @transform_12, window_bounds = array<i64: 8, 1>}]} {
    %c0 = arith.constant 0 : index
    %c0_0 = arith.constant 0 : index
    %0 = vector.load %arg7[%c0, %c0_0] : memref<66x16xbf16, #tpu.memory_space<vmem>>, vector<66x16xbf16>
    %c0_1 = arith.constant 0 : index
    %c0_2 = arith.constant 0 : index
    %1 = vector.load %arg8[%c0_1, %c0_2] : memref<1x16xf32, #tpu.memory_space<vmem>>, vector<1x16xf32>
    %2 = vector.shape_cast %1 : vector<1x16xf32> to vector<1x16xf32>
    %3 = vector.broadcast %2 : vector<1x16xf32> to vector<8x16xf32>
    %c0_3 = arith.constant 0 : index
    %c0_4 = arith.constant 0 : index
    %4 = vector.load %arg1[%c0_3, %c0_4] : memref<8x16xf32, #tpu.memory_space<vmem>>, vector<8x16xf32>
    %5 = arith.truncf %4 : vector<8x16xf32> to vector<8x16xbf16>
    %6 = vector.extract_strided_slice %0 {offsets = [0, 0], sizes = [16, 16], strides = [1, 1]} : vector<66x16xbf16> to vector<16x16xbf16>
    %cst = arith.constant dense<0.000000e+00> : vector<8x16xf32>
    %7 = tpu.matmul %5, %6, %cst {dimension_numbers = #tpu.dot_dimension_numbers<[1], [0], [0], [1], [0, 0, 1, 1], [], []>} : vector<8x16xbf16>, vector<16x16xbf16>, vector<8x16xf32> -> vector<8x16xf32>
    %8 = arith.addf %3, %7 : vector<8x16xf32>
    %c0_5 = arith.constant 0 : index
    %c0_6 = arith.constant 0 : index
    %9 = vector.load %arg2[%c0_5, %c0_6] : memref<8x16xf32, #tpu.memory_space<vmem>>, vector<8x16xf32>
    %10 = arith.truncf %9 : vector<8x16xf32> to vector<8x16xbf16>
    %11 = vector.extract_strided_slice %0 {offsets = [16, 0], sizes = [16, 16], strides = [1, 1]} : vector<66x16xbf16> to vector<16x16xbf16>
    %cst_7 = arith.constant dense<0.000000e+00> : vector<8x16xf32>
    %12 = tpu.matmul %10, %11, %cst_7 {dimension_numbers = #tpu.dot_dimension_numbers<[1], [0], [0], [1], [0, 0, 1, 1], [], []>} : vector<8x16xbf16>, vector<16x16xbf16>, vector<8x16xf32> -> vector<8x16xf32>
    %13 = arith.addf %8, %12 : vector<8x16xf32>
    %c0_8 = arith.constant 0 : index
    %c0_9 = arith.constant 0 : index
    %14 = vector.load %arg3[%c0_8, %c0_9] : memref<8x16xf32, #tpu.memory_space<vmem>>, vector<8x16xf32>
    %15 = arith.truncf %14 : vector<8x16xf32> to vector<8x16xbf16>
    %16 = vector.extract_strided_slice %0 {offsets = [32, 0], sizes = [16, 16], strides = [1, 1]} : vector<66x16xbf16> to vector<16x16xbf16>
    %cst_10 = arith.constant dense<0.000000e+00> : vector<8x16xf32>
    %17 = tpu.matmul %15, %16, %cst_10 {dimension_numbers = #tpu.dot_dimension_numbers<[1], [0], [0], [1], [0, 0, 1, 1], [], []>} : vector<8x16xbf16>, vector<16x16xbf16>, vector<8x16xf32> -> vector<8x16xf32>
    %18 = arith.addf %13, %17 : vector<8x16xf32>
    %c0_11 = arith.constant 0 : index
    %c0_12 = arith.constant 0 : index
    %19 = vector.load %arg4[%c0_11, %c0_12] : memref<8x16xf32, #tpu.memory_space<vmem>>, vector<8x16xf32>
    %20 = arith.truncf %19 : vector<8x16xf32> to vector<8x16xbf16>
    %21 = vector.extract_strided_slice %0 {offsets = [48, 0], sizes = [16, 16], strides = [1, 1]} : vector<66x16xbf16> to vector<16x16xbf16>
    %cst_13 = arith.constant dense<0.000000e+00> : vector<8x16xf32>
    %22 = tpu.matmul %20, %21, %cst_13 {dimension_numbers = #tpu.dot_dimension_numbers<[1], [0], [0], [1], [0, 0, 1, 1], [], []>} : vector<8x16xbf16>, vector<16x16xbf16>, vector<8x16xf32> -> vector<8x16xf32>
    %23 = arith.addf %18, %22 : vector<8x16xf32>
    %24 = vector.extract_strided_slice %0 {offsets = [64, 0], sizes = [1, 16], strides = [1, 1]} : vector<66x16xbf16> to vector<1x16xbf16>
    %25 = arith.extf %24 : vector<1x16xbf16> to vector<1x16xf32>
    %26 = vector.extract_strided_slice %0 {offsets = [65, 0], sizes = [1, 16], strides = [1, 1]} : vector<66x16xbf16> to vector<1x16xbf16>
    %27 = arith.extf %26 : vector<1x16xbf16> to vector<1x16xf32>
    %c0_14 = arith.constant 0 : index
    %c0_15 = arith.constant 0 : index
    %28 = vector.load %arg5[%c0_14, %c0_15] : memref<8x1xf32, #tpu.memory_space<vmem>>, vector<8x1xf32>
    %29 = vector.broadcast %28 : vector<8x1xf32> to vector<8x16xf32>
    %30 = vector.broadcast %25 : vector<1x16xf32> to vector<8x16xf32>
    %31 = arith.mulf %29, %30 : vector<8x16xf32>
    %32 = arith.addf %23, %31 : vector<8x16xf32>
    %c0_16 = arith.constant 0 : index
    %c0_17 = arith.constant 0 : index
    %33 = vector.load %arg6[%c0_16, %c0_17] : memref<8x1xf32, #tpu.memory_space<vmem>>, vector<8x1xf32>
    %34 = vector.broadcast %33 : vector<8x1xf32> to vector<8x16xf32>
    %35 = vector.broadcast %27 : vector<1x16xf32> to vector<8x16xf32>
    %36 = arith.mulf %34, %35 : vector<8x16xf32>
    %37 = arith.addf %32, %36 : vector<8x16xf32>
    %cst_18 = arith.constant 0.000000e+00 : f32
    %38 = vector.broadcast %cst_18 : f32 to vector<8x16xf32>
    %39 = arith.maximumf %37, %38 : vector<8x16xf32>
    %40 = arith.truncf %39 : vector<8x16xf32> to vector<8x16xbf16>
    %c0_19 = arith.constant 0 : index
    %c0_20 = arith.constant 0 : index
    %41 = vector.load %arg9[%c0_19, %c0_20] : memref<16x8xbf16, #tpu.memory_space<vmem>>, vector<16x8xbf16>
    %cst_21 = arith.constant dense<0.000000e+00> : vector<8x8xf32>
    %42 = tpu.matmul %40, %41, %cst_21 {dimension_numbers = #tpu.dot_dimension_numbers<[1], [0], [0], [1], [0, 0, 1, 1], [], []>} : vector<8x16xbf16>, vector<16x8xbf16>, vector<8x8xf32> -> vector<8x8xf32>
    %c0_22 = arith.constant 0 : index
    %c0_23 = arith.constant 0 : index
    %43 = vector.load %arg10[%c0_22, %c0_23] : memref<1x8xf32, #tpu.memory_space<vmem>>, vector<1x8xf32>
    %44 = vector.broadcast %43 : vector<1x8xf32> to vector<8x8xf32>
    %45 = arith.addf %42, %44 : vector<8x8xf32>
    %cst_24 = arith.constant 0.000000e+00 : f32
    %46 = vector.broadcast %cst_24 : f32 to vector<8x8xf32>
    %47 = arith.maximumf %45, %46 : vector<8x8xf32>
    %c0_25 = arith.constant 0 : index
    %c0_26 = arith.constant 0 : index
    %48 = vector.load %arg11[%c0_25, %c0_26] : memref<1x8xbf16, #tpu.memory_space<vmem>>, vector<1x8xbf16>
    %49 = arith.extf %48 : vector<1x8xbf16> to vector<1x8xf32>
    %50 = vector.broadcast %49 : vector<1x8xf32> to vector<8x8xf32>
    %51 = arith.mulf %47, %50 : vector<8x8xf32>
    %cst_27 = arith.constant dense<0.000000e+00> : vector<8xf32>
    %52 = vector.multi_reduction <add>, %51, %cst_27 [1] : vector<8x8xf32> to vector<8xf32>
    %53 = vector.shape_cast %52 : vector<8xf32> to vector<8x1xf32>
    %c0_28 = arith.constant 0 : index
    %c0_29 = arith.constant 0 : index
    %54 = vector.load %arg12[%c0_28, %c0_29] : memref<1x1xf32, #tpu.memory_space<vmem>>, vector<1x1xf32>
    %55 = vector.broadcast %54 : vector<1x1xf32> to vector<8x1xf32>
    %56 = arith.addf %53, %55 : vector<8x1xf32>
    %57 = arith.negf %56 : vector<8x1xf32>
    %58 = math.exp %57 : vector<8x1xf32>
    %cst_30 = arith.constant 1.000000e+00 : f32
    %59 = vector.broadcast %cst_30 : f32 to vector<8x1xf32>
    %60 = arith.addf %59, %58 : vector<8x1xf32>
    %61 = arith.divf %59, %60 : vector<8x1xf32>
    %c0_31 = arith.constant 0 : index
    %c0_32 = arith.constant 0 : index
    %62 = vector.load %arg13[%c0_31, %c0_32] : memref<8x1xf32, #tpu.memory_space<vmem>>, vector<8x1xf32>
    tpu.vector_store %arg13[%c0_31, %c0_32], %61 {strides = array<i32>} : memref<8x1xf32, #tpu.memory_space<vmem>>, vector<8x1xf32>,
    return
  }
  func.func @transform_0(%arg0: i32) -> (i32, i32) {
    %c0_i32 = arith.constant 0 : i32
    %c0_i32_0 = arith.constant 0 : i32
    return %arg0, %c0_i32 : i32, i32
  }
  func.func @transform_1(%arg0: i32) -> (i32, i32) {
    %c0_i32 = arith.constant 0 : i32
    %c0_i32_0 = arith.constant 0 : i32
    return %arg0, %c0_i32 : i32, i32
  }
  func.func @transform_2(%arg0: i32) -> (i32, i32) {
    %c0_i32 = arith.constant 0 : i32
    %c0_i32_0 = arith.constant 0 : i32
    return %arg0, %c0_i32 : i32, i32
  }
  func.func @transform_3(%arg0: i32) -> (i32, i32) {
    %c0_i32 = arith.constant 0 : i32
    %c0_i32_0 = arith.constant 0 : i32
    return %arg0, %c0_i32 : i32, i32
  }
  func.func @transform_4(%arg0: i32) -> (i32, i32) {
    %c0_i32 = arith.constant 0 : i32
    %c0_i32_0 = arith.constant 0 : i32
    return %arg0, %c0_i32 : i32, i32
  }
  func.func @transform_5(%arg0: i32) -> (i32, i32) {
    %c0_i32 = arith.constant 0 : i32
    %c0_i32_0 = arith.constant 0 : i32
    return %arg0, %c0_i32 : i32, i32
  }
  func.func @transform_6(%arg0: i32) -> (i32, i32) {
    %c0_i32 = arith.constant 0 : i32
    %c0_i32_0 = arith.constant 0 : i32
    %c0_i32_1 = arith.constant 0 : i32
    return %c0_i32, %c0_i32_0 : i32, i32
  }
  func.func @transform_7(%arg0: i32) -> (i32, i32) {
    %c0_i32 = arith.constant 0 : i32
    %c0_i32_0 = arith.constant 0 : i32
    %c0_i32_1 = arith.constant 0 : i32
    return %c0_i32, %c0_i32_0 : i32, i32
  }
  func.func @transform_8(%arg0: i32) -> (i32, i32) {
    %c0_i32 = arith.constant 0 : i32
    %c0_i32_0 = arith.constant 0 : i32
    %c0_i32_1 = arith.constant 0 : i32
    return %c0_i32, %c0_i32_0 : i32, i32
  }
  func.func @transform_9(%arg0: i32) -> (i32, i32) {
    %c0_i32 = arith.constant 0 : i32
    %c0_i32_0 = arith.constant 0 : i32
    %c0_i32_1 = arith.constant 0 : i32
    return %c0_i32, %c0_i32_0 : i32, i32
  }
  func.func @transform_10(%arg0: i32) -> (i32, i32) {
    %c0_i32 = arith.constant 0 : i32
    %c0_i32_0 = arith.constant 0 : i32
    %c0_i32_1 = arith.constant 0 : i32
    return %c0_i32, %c0_i32_0 : i32, i32
  }
  func.func @transform_11(%arg0: i32) -> (i32, i32) {
    %c0_i32 = arith.constant 0 : i32
    %c0_i32_0 = arith.constant 0 : i32
    %c0_i32_1 = arith.constant 0 : i32
    return %c0_i32, %c0_i32_0 : i32, i32
  }
  func.func @transform_12(%arg0: i32) -> (i32, i32) {
    %c0_i32 = arith.constant 0 : i32
    %c0_i32_0 = arith.constant 0 : i32
    return %arg0, %c0_i32 : i32, i32
  }
}

</mosaic_0001>

<bundles_post_ra>
// kernel: pers_forward.1
= control target key start
LH: loop header
LB: loop body
LE: loop exit
PB: predicated region body
PF: predicated region fallthrough
CT: control target
= control target key end

     0   :  { %v286_v3 = vmov 0   ;;  %vm65_vm0 = vcmask 130048   ;;  %vm212_vm1 = vcmask 64512   ;;  %vm240_vm4 = vcmask 7168   ;;  %s408_s6 = inlined_call_operand.vmem [shape: bf16[66,16], index: 6, kind: input, shape index: {}]   ;;  %s409_s0 = inlined_call_operand.vmem [shape: f32[8,16], index: 0, kind: input, shape index: {}]   ;;  %s410_s1 = inlined_call_operand.vmem [shape: f32[8,16], index: 1, kind: input, shape index: {}]   ;;  %s411_s2 = inlined_call_operand.vmem [shape: f32[8,16], index: 2, kind: input, shape index: {}]   ;;  %s412_s3 = inlined_call_operand.vmem [shape: f32[8,16], index: 3, kind: input, shape index: {}]   ;;  %s413_s4 = inlined_call_operand.vmem [shape: f32[8,1], index: 4, kind: input, shape index: {}]   ;;  %s414_s7 = inlined_call_operand.vmem [shape: f32[1,16], index: 7, kind: input, shape index: {}]   ;;  %s415_s5 = inlined_call_operand.vmem [shape: f32[8,1], index: 5, kind: input, shape index: {}]   ;;  %s416_s9 = inlined_call_operand.vmem [shape: f32[1,8], index: 9, kind: input, shape index: {}]   ;;  %s417_s8 = inlined_call_operand.vmem [shape: bf16[16,8], index: 8, kind: input, shape index: {}]   ;;  %s418_s11 = inlined_call_operand.<no memory space> [shape: f32[1,1], index: 11, kind: input, shape index: {}]   ;;  %s419_s10 = inlined_call_operand.vmem [shape: bf16[1,8], index: 10, kind: input, shape index: {}]   ;;  %s420_s12 = inlined_call_operand.vmem [shape: f32[8,1], index: 12, kind: output, shape index: {}]  }
   0x1   :  { %v272_v0 = vld [vmem:[%s408_s6] sm:$0xff]  ;;  %v273_v1 = vld [vmem:[%s408_s6 + $0x8] sm:$0xff]  ;;  %v274_v2 = vld [vmem:[%s408_s6 + $0x10] sm:$0xff]  ;;  %278 = vset.pattern.permute.xlu0 %v286_v3  ;;  %v17_v41 = vstv %s418_s11 }
   0x2   :  { %v275_v4 = vld [vmem:[%s408_s6 + $0x18] sm:$0xff]  ;;  %v57_v5 = vld [vmem:[%s409_s0] sm:$0xff]  ;;  %76 = vmatpush.bf16.msra.mxu0 %v272_v0  ;;  %101 = vmatpush.bf16.msra.mxu1 %v273_v1  ;;  %18 = vst [vmem:[#allocation2] sm:$0x1] %v17_v41 }
   0x3   :  { %v83_v6 = vld [vmem:[%s410_s1] sm:$0xff]  ;;  %v58_v7 = vpack.c.bf16 %v57_v5, %v57_v5  ;;  %126 = vmatpush.bf16.msra.mxu2 %v274_v2  ;;  %151 = vmatpush.bf16.msra.mxu3 %v275_v4 }
   0x4   :  { %v84_v8 = vpack.c.bf16 %v83_v6, %v83_v6  ;;  %v108_v9 = vld [vmem:[%s411_s2] sm:$0xff] }
   0x5   :  { %v133_v10 = vld [vmem:[%s412_s3] sm:$0xff]  ;;  %v109_v12 = vpack.c.bf16 %v108_v9, %v108_v9  ;;  %250 = vmatmul.msk.bf16.vlgmr.msra.gmra.mxu0 %vm65_vm0, %v58_v7 }
   0x6   :  { %v159_v11 = vld [vmem:[%s413_s4] sm:$0xff]  ;;  %v134_v13 = vpack.c.bf16 %v133_v10, %v133_v10  ;;  %255 = vmatmul.msk.bf16.vlgmr.msra.gmra.mxu1 %vm65_vm0, %v84_v8 }
   0x7   :  { %162 = vperm.xlu0 %278, %v159_v11   ;;  %260 = vmatmul.msk.bf16.vlgmr.msra.gmra.mxu2 %vm65_vm0, %v109_v12  ;;  %v168_v14 = vld [vmem:[%s415_s5] sm:$0xff] }
   0x8   :  { %265 = vmatmul.msk.bf16.vlgmr.msra.gmra.mxu3 %vm65_vm0, %v134_v13  ;;  %v276_v15 = vld [vmem:[%s417_s8] sm:$0xff] }
   0x9   :  { %201 = vmatpush.bf16.msrb.mxu0 %v276_v15  ;;  %v279_v16 = vld [vmem:[%s414_s7] ss:$0 sm:$0xff] }
   0xa   :  { %v52_v17 = vld [vmem:[%s408_s6 + $0x20] sm:$0x1] }
   0xb   :  { %v158_v22 = vunpack.c.l.bf16 %v52_v17  ;;  %v208_v42 = vld [vmem:[%s419_s10] sm:$0x1] }
   0xc   :  { %v280_v43 = vld [vmem:[%s416_s9] ss:$0 sm:$0xff]  ;;  %v209_v44 = vunpack.c.l.bf16 %v208_v42 }
   0xd   :  { %v165_v24 = vperm.slane %v158_v22, 0  ;;  %v174_v27 = vperm.slane %v158_v22, 1  ;;  %v281_v52 = vld [vmem:[#allocation2] ss:$0 sm:$0xff] }
   0xe   :  { %v210_v47 = vperm.slane %v209_v44, 0 }
   0xf   :  { %171 = vperm.xlu0 %278, %v168_v14  }
  0x79   :  { %v163_v18 = vpop.permute.xlu0 %162 }
  0x7a   :  { %v166_v32 = vmul.f32 %v165_v24, %v163_v18 }
  0x81   :  { %v172_v31 = vpop.permute.xlu0 %171 }
  0x82   :  { %v78_v19 = vpop.f32.mrf.mxu0  ;;  %v175_v34 = vmul.f32 %v174_v27, %v172_v31 }
  0x83   :  { %v103_v20 = vpop.f32.mrf.mxu1  ;;  %v82_v21 = vadd.f32 %v279_v16, %v78_v19 }
  0x85   :  { %v107_v23 = vadd.f32 %v103_v20, %v82_v21 }
  0x8a   :  { %v128_v25 = vpop.f32.mrf.mxu2  ;;  %v80_v29 = vpop.f32.mrf.mxu0 }
  0x8b   :  { %v153_v26 = vpop.f32.mrf.mxu3  ;;  %v132_v28 = vadd.f32 %v128_v25, %v107_v23  ;;  %v105_v30 = vpop.f32.mrf.mxu1 }
  0x8d   :  { %v157_v33 = vadd.f32 %v153_v26, %v132_v28 }
  0x8f   :  { %v167_v35 = vadd.f32 %v166_v32, %v157_v33 }
  0x91   :  { %v176_v36 = vadd.f32 %v175_v34, %v167_v35 }
  0x92   :  { %v130_v37 = vpop.f32.mrf.mxu2 }
  0x93   :  { %v155_v38 = vpop.f32.mrf.mxu3  ;;  %v177_v39 = vmax.f32 %v176_v36, 0.0 }
  0x95   :  { %v178_v40 = vpack.c.bf16 %v177_v39, %v177_v39 }
  0x97   :  { %270 = vmatmul.msk.bf16.vlgmr.msrb.gmra.mxu0 %vm65_vm0, %v178_v40 }
 0x114   :  { %v203_v45 = vpop.f32.mrf.mxu0 }
 0x115   :  { %v204_v46 = vadd.f32 %v280_v43, %v203_v45 }
 0x117   :  { %v207_v48 = vmax.f32 %v204_v46, 0.0 }
 0x119   :  { %v211_v49 = vmul.f32 %v210_v47, %v207_v48 }
 0x11b   :  { %v213_v50 = vsel %vm212_vm1, %v211_v49, 0.0 }
 0x11c   :  { %v205_v51 = vpop.f32.mrf.mxu0  ;;  %214 = vadd.xlane.f32.xlu1 %v213_v50 }
 0x18f   :  { %v215_v53 = vpop.xlane.xlu1 %214 }
 0x190   :  { %v220_v54 = vadd.f32 %v281_v52, %v215_v53 }
 0x192   :  { %v271_v55 = vmul.f32 -1.442695, %v220_v54 }
 0x194   :  { %282 = vpow2.f32 %v271_v55 }
 0x19a   :  { %v283_v56 = vpop.eup %282 }
 0x19b   :  { %v224_v57 = vadd.f32 1.0, %v283_v56 }
 0x19d   :  { %284 = vrcp.f32 %v224_v57  ;;  %v236_v61 = vand.u32 2147483648, %v224_v57  ;;  %v234_v63 = vand.u32 2147483647, %v224_v57  ;;  %vm230_vm3 = vweird.f32 %v224_v57 }
 0x19f   :  { %v237_v1 = vor.u32 1.1754944e-38, %v236_v61  ;;  %vm235_vm6 = vcmp.eq.f32.partialorder %v234_v63, 8.507059e+37 }
 0x1a3   :  { %v285_v58 = vpop.eup %284 }
 0x1a4   :  { %v226_v59 = vmul.f32 %v285_v58, %v224_v57  ;;  %vm231_vm2 = vweird.f32 %v285_v58 }
 0x1a5   :  { %vm232_vm5 = vmor %vm230_vm3, %vm231_vm2 }
 0x1a6   :  { %v227_v60 = vsub.f32 1.0, %v226_v59 }
 0x1a8   :  { %v228_v62 = vmul.f32 %v285_v58, %v227_v60 }
 0x1aa   :  { %v229_v0 = vadd.f32 %v285_v58, %v228_v62 }
 0x1ac   :  { %v233_v2 = vsel %vm232_vm5, %v285_v58, %v229_v0 }
 0x1ad   :  { %v238_v3 = vsel %vm235_vm6, %v237_v1, %v233_v2 }
 0x1ae   :  { %241 = vst.msk [vmem:[%s420_s12] sm:$0xff] %vm240_vm4, %v238_v3 }

</bundles_post_ra>
